<compile_context>
chip_gen: v5e
topology: v5e:2x2
jax: 0.10.0
libtpu: 0.0.40
codegen_flags: <defaults>
</compile_context>

<pallas_src>
import functools

import numpy as np
import jax
import jax.numpy as jnp
from jax.experimental import pallas as pl
from jax.experimental.pallas import tpu as pltpu

_LANE = 128
_MAX_TILE = 8192  # lanes per grid step; ~0.6 MB double-buffered VMEM, fits all gens


def _backproj_kernel(invk_ref, depth_ref, out_ref, *, width, tile):
    """One (batch, lane-tile) step of backprojection.

    invk_ref : SMEM (N, 9)       row-major flattened inv_K[:, :3, :3]
    depth_ref: VMEM (1, 1, tile) depth tile
    out_ref  : VMEM (1, 4, tile) homogeneous 3D points tile
    """
    n = pl.program_id(0)
    t = pl.program_id(1)

    # Global flat pixel index of each lane in this tile (exact in f32 for < 2**24).
    lane = jax.lax.broadcasted_iota(jnp.int32, (1, tile), 1)
    g = (lane + t * tile).astype(jnp.float32)

    # Exact divmod by `width`: approximate quotient via reciprocal multiply, then a
    # +/-1 correction step (error of the f32 approximation is at most 1).
    w_f = jnp.float32(width)
    y = jnp.floor(g * jnp.float32(1.0 / width))
    r = g - y * w_f
    y = y + (r >= w_f).astype(jnp.float32) - (r < 0.0).astype(jnp.float32)
    x = g - y * w_f                                   # x in [0, width)

    d = depth_ref[0]                                  # (1, tile)

    k = lambda i, j: invk_ref[n, 3 * i + j]           # scalar reads from SMEM
    px = (k(0, 0) * x + k(0, 1) * y + k(0, 2)) * d
    py = (k(1, 0) * x + k(1, 1) * y + k(1, 2)) * d
    pz = (k(2, 0) * x + k(2, 1) * y + k(2, 2)) * d
    ones = jnp.ones((1, tile), jnp.float32)

    out_ref[0] = jnp.concatenate([px, py, pz, ones], axis=0)


def _pick_tile(hw):
    """Largest multiple of 128 that divides hw (capped at _MAX_TILE); None if hw % 128 != 0."""
    if hw % _LANE != 0:
        return None
    best = _LANE
    t = _LANE
    cap = min(_MAX_TILE, hw)
    while t <= cap:
        if hw % t == 0:
            best = t
        t += _LANE
    return best


def backprojection(depth, inv_K, height, width, img_like_out=False):
    """
    Args:
        depth : (N, 1, H, W) float depth map
        inv_K : (N, 4, 4)    float inverse camera intrinsics
    Returns:
        points: (N, 4, H*W)  (or (N, 4, H, W) if img_like_out)
    """
    N = depth.shape[0]
    HW = height * width

    depth_flat = depth.reshape(N, 1, HW).astype(jnp.float32)
    invk_flat = inv_K[:, :3, :3].astype(jnp.float32).reshape(N, 9)

    tile = _pick_tile(HW)
    if tile is None:
        # HW not lane-aligned: pad the flattened pixel axis and slice the result.
        tile = min(_MAX_TILE, ((HW + _LANE - 1) // _LANE) * _LANE)
        hw_pad = ((HW + tile - 1) // tile) * tile
        depth_flat = jnp.pad(depth_flat, ((0, 0), (0, 0), (0, hw_pad - HW)))
    else:
        hw_pad = HW

    assert hw_pad < (1 << 24), "in-kernel coordinate generation assumes H*W < 2**24"

    num_tiles = hw_pad // tile
    grid = (N, num_tiles)

    kernel = functools.partial(_backproj_kernel, width=width, tile=tile)

    points = pl.pallas_call(
        kernel,
        out_shape=jax.ShapeDtypeStruct((N, 4, hw_pad), jnp.float32),
        grid_spec=pltpu.PrefetchScalarGridSpec(
            num_scalar_prefetch=0,
            grid=grid,
            in_specs=[
                # Full (N, 9) inverse-intrinsics table in SMEM (scalar reads only).
                pl.BlockSpec(memory_space=pltpu.MemorySpace.SMEM),
                # Depth tile streamed from HBM.
                pl.BlockSpec((1, 1, tile), lambda n, t: (n, 0, t)),
            ],
            out_specs=pl.BlockSpec((1, 4, tile), lambda n, t: (n, 0, t)),
        ),
        compiler_params=pltpu.CompilerParams(
            dimension_semantics=("parallel", "parallel")
        ),
    )(invk_flat, depth_flat)

    if hw_pad != HW:
        points = points[:, :, :HW]
    if img_like_out:
        points = points.reshape(N, 4, height, width)
    return points


def backprojection_ref(depth, inv_K, height, width, img_like_out=False):
    """Pure-JAX reference mirroring the PyTorch forward."""
    N = depth.shape[0]
    HW = height * width
    mesh = np.meshgrid(range(width), range(height), indexing="xy")
    id_coords = np.stack(mesh, axis=0).astype(np.float32)       # (2, H, W)
    xy = jnp.asarray(
        np.stack(
            [id_coords[0].reshape(-1), id_coords[1].reshape(-1), np.ones(HW, np.float32)],
            axis=0,
        )
    )                                                            # (3, HW)
    pts = jnp.einsum("nij,jk->nik", inv_K[:, :3, :3].astype(jnp.float32), xy)
    pts = depth.reshape(N, 1, HW).astype(jnp.float32) * pts
    ones = jnp.ones((N, 1, HW), jnp.float32)
    out = jnp.concatenate([pts, ones], axis=1)                   # (N, 4, HW)
    if img_like_out:
        out = out.reshape(N, 4, height, width)
    return out


if __name__ == "__main__":
    N, H, W = 2, 16, 16
    key = jax.random.PRNGKey(0)
    k_d, k_k = jax.random.split(key)

    depth = jax.random.uniform(k_d, (N, 1, H, W), jnp.float32, 0.1, 10.0)
    # Deterministic synthetic inverse intrinsics (any 4x4 works for the forward).
    inv_K = jax.random.normal(k_k, (N, 4, 4), jnp.float32) * 0.1
    inv_K = inv_K.at[:, jnp.arange(4), jnp.arange(4)].add(1.0)

    out = jax.block_until_ready(backprojection(depth, inv_K, H, W, img_like_out=False))
    ref = backprojection_ref(depth, inv_K, H, W, img_like_out=False)
    np.testing.assert_allclose(np.asarray(out), np.asarray(ref), rtol=1e-5, atol=1e-5)

    # Exercise the img_like_out=True path (pure reshape of kernel output).
    out_img = jax.block_until_ready(backprojection(depth, inv_K, H, W, img_like_out=True))
    assert out_img.shape == (N, 4, H, W)
    np.testing.assert_allclose(
        np.asarray(out_img),
        np.asarray(backprojection_ref(depth, inv_K, H, W, img_like_out=True)),
        rtol=1e-5,
        atol=1e-5,
    )

    print("KERNEL_OK")
</pallas_src>

<mosaic_0001>
module attributes {stable_mosaic.version = 11 : i64} {
  func.func @_backproj_kernel(%arg0: i32, %arg1: i32, %arg2: memref<2x9xf32, #tpu.memory_space<smem>>, %arg3: memref<1x1x256xf32, #tpu.memory_space<vmem>>, %arg4: memref<1x4x256xf32, #tpu.memory_space<vmem>>) attributes {dimension_semantics = [#tpu.dimension_semantics<parallel>, #tpu.dimension_semantics<parallel>], iteration_bounds = array<i64: 2, 1>, scalar_prefetch = 0 : i64, scratch_operands = 0 : i64, tpu.core_type = #tpu.core_type<tc>, window_params = [{transform_indices = @transform_0, window_bounds = array<i64: 2, 9>}, {transform_indices = @transform_1, window_bounds = array<i64: 1, 1, 256>}, {transform_indices = @transform_2, window_bounds = array<i64: 1, 4, 256>}]} {
    %0 = tpu.iota {dimensions = array<i32: 1>} : vector<1x256xi32>
    %c256_i32 = arith.constant 256 : i32
    %1 = arith.muli %arg1, %c256_i32 : i32
    %2 = vector.broadcast %1 : i32 to vector<1x256xi32>
    %3 = arith.addi %0, %2 : vector<1x256xi32>
    %4 = arith.sitofp %3 : vector<1x256xi32> to vector<1x256xf32>
    %cst = arith.constant 6.250000e-02 : f32
    %5 = vector.broadcast %cst : f32 to vector<1x256xf32>
    %6 = arith.mulf %4, %5 : vector<1x256xf32>
    %7 = math.floor %6 : vector<1x256xf32>
    %cst_0 = arith.constant 1.600000e+01 : f32
    %8 = vector.broadcast %cst_0 : f32 to vector<1x256xf32>
    %9 = arith.mulf %7, %8 : vector<1x256xf32>
    %10 = arith.subf %4, %9 : vector<1x256xf32>
    %cst_1 = arith.constant 1.600000e+01 : f32
    %11 = vector.broadcast %cst_1 : f32 to vector<1x256xf32>
    %12 = arith.cmpf oge, %10, %11 : vector<1x256xf32>
    %13 = arith.extui %12 : vector<1x256xi1> to vector<1x256xi32>
    %14 = arith.sitofp %13 : vector<1x256xi32> to vector<1x256xf32>
    %15 = arith.addf %7, %14 : vector<1x256xf32>
    %cst_2 = arith.constant 0.000000e+00 : f32
    %16 = vector.broadcast %cst_2 : f32 to vector<1x256xf32>
    %17 = arith.cmpf olt, %10, %16 : vector<1x256xf32>
    %18 = arith.extui %17 : vector<1x256xi1> to vector<1x256xi32>
    %19 = arith.sitofp %18 : vector<1x256xi32> to vector<1x256xf32>
    %20 = arith.subf %15, %19 : vector<1x256xf32>
    %cst_3 = arith.constant 1.600000e+01 : f32
    %21 = vector.broadcast %cst_3 : f32 to vector<1x256xf32>
    %22 = arith.mulf %20, %21 : vector<1x256xf32>
    %23 = arith.subf %4, %22 : vector<1x256xf32>
    %c0 = arith.constant 0 : index
    %c0_4 = arith.constant 0 : index
    %c0_5 = arith.constant 0 : index
    %24 = vector.load %arg3[%c0, %c0_4, %c0_5] : memref<1x1x256xf32, #tpu.memory_space<vmem>>, vector<1x1x256xf32>
    %25 = vector.shape_cast %24 : vector<1x1x256xf32> to vector<1x256xf32>
    %26 = arith.index_cast %arg0 : i32 to index
    %c0_6 = arith.constant 0 : index
    %27 = memref.load %arg2[%26, %c0_6] : memref<2x9xf32, #tpu.memory_space<smem>>
    %28 = vector.broadcast %27 : f32 to vector<1x256xf32>
    %29 = arith.mulf %28, %23 : vector<1x256xf32>
    %30 = arith.index_cast %arg0 : i32 to index
    %c1 = arith.constant 1 : index
    %31 = memref.load %arg2[%30, %c1] : memref<2x9xf32, #tpu.memory_space<smem>>
    %32 = vector.broadcast %31 : f32 to vector<1x256xf32>
    %33 = arith.mulf %32, %20 : vector<1x256xf32>
    %34 = arith.addf %29, %33 : vector<1x256xf32>
    %35 = arith.index_cast %arg0 : i32 to index
    %c2 = arith.constant 2 : index
    %36 = memref.load %arg2[%35, %c2] : memref<2x9xf32, #tpu.memory_space<smem>>
    %37 = vector.broadcast %36 : f32 to vector<1x256xf32>
    %38 = arith.addf %34, %37 : vector<1x256xf32>
    %39 = arith.mulf %38, %25 : vector<1x256xf32>
    %40 = arith.index_cast %arg0 : i32 to index
    %c3 = arith.constant 3 : index
    %41 = memref.load %arg2[%40, %c3] : memref<2x9xf32, #tpu.memory_space<smem>>
    %42 = vector.broadcast %41 : f32 to vector<1x256xf32>
    %43 = arith.mulf %42, %23 : vector<1x256xf32>
    %44 = arith.index_cast %arg0 : i32 to index
    %c4 = arith.constant 4 : index
    %45 = memref.load %arg2[%44, %c4] : memref<2x9xf32, #tpu.memory_space<smem>>
    %46 = vector.broadcast %45 : f32 to vector<1x256xf32>
    %47 = arith.mulf %46, %20 : vector<1x256xf32>
    %48 = arith.addf %43, %47 : vector<1x256xf32>
    %49 = arith.index_cast %arg0 : i32 to index
    %c5 = arith.constant 5 : index
    %50 = memref.load %arg2[%49, %c5] : memref<2x9xf32, #tpu.memory_space<smem>>
    %51 = vector.broadcast %50 : f32 to vector<1x256xf32>
    %52 = arith.addf %48, %51 : vector<1x256xf32>
    %53 = arith.mulf %52, %25 : vector<1x256xf32>
    %54 = arith.index_cast %arg0 : i32 to index
    %c6 = arith.constant 6 : index
    %55 = memref.load %arg2[%54, %c6] : memref<2x9xf32, #tpu.memory_space<smem>>
    %56 = vector.broadcast %55 : f32 to vector<1x256xf32>
    %57 = arith.mulf %56, %23 : vector<1x256xf32>
    %58 = arith.index_cast %arg0 : i32 to index
    %c7 = arith.constant 7 : index
    %59 = memref.load %arg2[%58, %c7] : memref<2x9xf32, #tpu.memory_space<smem>>
    %60 = vector.broadcast %59 : f32 to vector<1x256xf32>
    %61 = arith.mulf %60, %20 : vector<1x256xf32>
    %62 = arith.addf %57, %61 : vector<1x256xf32>
    %63 = arith.index_cast %arg0 : i32 to index
    %c8 = arith.constant 8 : index
    %64 = memref.load %arg2[%63, %c8] : memref<2x9xf32, #tpu.memory_space<smem>>
    %65 = vector.broadcast %64 : f32 to vector<1x256xf32>
    %66 = arith.addf %62, %65 : vector<1x256xf32>
    %67 = arith.mulf %66, %25 : vector<1x256xf32>
    %cst_7 = arith.constant 1.000000e+00 : f32
    %68 = vector.broadcast %cst_7 : f32 to vector<1x256xf32>
    %69 = tpu.concatenate %39, %53, %67, %68 in 0 : vector<1x256xf32>, vector<1x256xf32>, vector<1x256xf32>, vector<1x256xf32> -> vector<4x256xf32>
    %c0_8 = arith.constant 0 : index
    %c0_9 = arith.constant 0 : index
    %c0_10 = arith.constant 0 : index
    %70 = vector.load %arg4[%c0_8, %c0_9, %c0_10] : memref<1x4x256xf32, #tpu.memory_space<vmem>>, vector<1x4x256xf32>
    %71 = vector.shape_cast %70 : vector<1x4x256xf32> to vector<4x256xf32>
    %72 = vector.shape_cast %69 : vector<4x256xf32> to vector<1x4x256xf32>
    tpu.vector_store %arg4[%c0_8, %c0_9, %c0_10], %72 {strides = array<i32>} : memref<1x4x256xf32, #tpu.memory_space<vmem>>, vector<1x4x256xf32>,
    return
  }
  func.func @transform_0(%arg0: i32, %arg1: i32) -> (i32, i32) {
    %c0_i32 = arith.constant 0 : i32
    %c0_i32_0 = arith.constant 0 : i32
    %c0_i32_1 = arith.constant 0 : i32
    return %c0_i32, %c0_i32_0 : i32, i32
  }
  func.func @transform_1(%arg0: i32, %arg1: i32) -> (i32, i32, i32) {
    %c0_i32 = arith.constant 0 : i32
    %c0_i32_0 = arith.constant 0 : i32
    return %arg0, %c0_i32, %arg1 : i32, i32, i32
  }
  func.func @transform_2(%arg0: i32, %arg1: i32) -> (i32, i32, i32) {
    %c0_i32 = arith.constant 0 : i32
    %c0_i32_0 = arith.constant 0 : i32
    return %arg0, %c0_i32, %arg1 : i32, i32, i32
  }
}

</mosaic_0001>

<bundles_post_ra>
// kernel: tpu_custom_call.1
= control target key start
LH: loop header
LB: loop body
LE: loop exit
PB: predicated region body
PF: predicated region fallthrough
CT: control target
= control target key end

     0   :  { %7 = vsyncpa [#allocation5], 0  ;;  %s871_s0 = inlined_call_operand.hbm [shape: f32[2,9], index: 0, kind: input, shape index: {}]   ;;  %s872_s1 = inlined_call_operand.hbm [shape: f32[2,1,256], index: 1, kind: input, shape index: {}]   ;;  %s873_s2 = inlined_call_operand.hbm [shape: f32[2,4,256], index: 2, kind: output, shape index: {}]  }
   0x1   :  { %8 = vsyncpa [#allocation3], 0 }
   0x2   :  { %10 = vsyncpa [#allocation3 + $0x1], 0 }
   0x3   :  { %11 = vsyncpa [#allocation4], 0 }
   0x4   :  { %13 = vsyncpa [#allocation4 + $0x1], 0  ;;  %s683_s9 = smov 0   ;;  %s685_s10 = smov 0  }
   0x5   :  { %s687_s11 = smov 0   ;;  %s689_s12 = smov 0  }
   0x6   :  { %s691_s13 = smov 0   ;;  %s693_s14 = smov 0  }
   0x7 LB: > { %s437_s15 = sadd.s32 4294967295, %s664_s14   ;;  %s438_s16 = sadd.s32 4294967294, %s664_s14   ;;  %s664_s14 = sphi %s693_s14, %s19_s14   ;;  %s660_s13 = sphi %s691_s13, %s885_s13   ;;  %s656_s12 = sphi %s689_s12, %s884_s12   ;;  %s652_s11 = sphi %s687_s11, %s883_s11   ;;  %s648_s10 = sphi %s685_s10, %s882_s10   ;;  %s644_s9 = sphi %s683_s9, %s881_s9  }
   0x8   : > { %p74_p0 = scmp.ne.s32.totalorder %s648_s10, %s644_s9  ;;  %p717_p1 = scmp.eq.s32.totalorder %s437_s15, 0 }
   0x9   : > { %p721_p2 = scmp.eq.s32.totalorder %s437_s15, 1  ;;  %p106_p3 = scmp.eq.s32.totalorder %s438_s16, 1 }
   0xa   : > { %p727_p4 = por %p717_p1, %p74_p0  ;;  %p439_p5 = scmp.ge.s32.totalorder %s664_s14, 1 }
   0xb   : > { %p732_p6 = por %p106_p3, %p74_p0  ;;  %p113_p7 = scmp.lt.s32.totalorder %s664_s14, 3 }
   0xc   : > { %s125_s23 = sshll.u32 %s871_s0, 4  ;;  %s31_s25 = sadd.s32 1, %s660_s13  ;;  %s126_s23 = int_to_ptr.hbm [resolvable:$true] %s125_s23 }
   0xd   : > { %p740_p8 = pnand %p439_p5, %p113_p7  ;;  %s61_s26 = sadd.s32 1, %s652_s11 }
   0xe   : > { %p33_p12 = scmp.ge.s32.totalorder %s31_s25, 2  ;;  %s666_s27 = smov [#allocation2]  }
   0xf   : > { %p467_p10 = pneg %p740_p8  ;;  %p68_p13 = scmp.ne.s32.totalorder %s652_s11, %s648_s10 }
  0x10   : > { %s887_s25 = smov (%p33_p12, %s31_s25), 0  ;;  %p69_p0 = scmp.eq.s32.totalorder %s664_s14, 0 }
  0x11   : > { %p468_p11 = pnand %p467_p10, %p717_p1  ;;  %s56_s28 = ssub.s32 %s660_s13, %s887_s25 }
  0x12   : > { %p480_p3 = scmp.lt.s32.totalorder %s664_s14, 2  ;;  %p59_p5 = scmp.eq.s32.totalorder %s56_s28, 0 }
  0x13   : > { %470 = dma.hbm_to_smem (!%p468_p11), %s126_s23, 32, %s666_s27, [#allocation5]  }
  0x14   : > { %p70_p7 = por %p69_p0, %p68_p13  ;;  %p761_p9 = por %p721_p2, %p68_p13 }
  0x15   : > { %s136_s30 = sand.u32 1, %s652_s11   ;;  %s443_s5 = sshll.u32 %s660_s13, 1 }
  0x16   : > { %s767_s3 = scalar_select %p59_p5, %s652_s11, %s61_s26  }
  0x17   : > { %s442_s4 = sshll.u32 %s136_s30, 1  ;;  %s146_s8 = scalar_lea.hbm %s872_s1, %s443_s5 }
  0x18   : > { %s140_s15 = scalar_lea.vmem [#allocation6], %s442_s4  ;;  %s148_s21 = sshll.u32 %s146_s8, 4  ;;  %s149_s21 = int_to_ptr.hbm [resolvable:$true] %s148_s21 }
  0x19   : > { %s150_s16 = sshll.u32 %s140_s15, 4  ;;  %p472_p10 = pnand %p480_p3, %p70_p7  ;;  %s151_s16 = int_to_ptr.vmem [resolvable:$true] %s150_s16 }
  0x1a   : > { %s137_s18 = scalar_lea.sflag [#allocation3], %s136_s30  ;;  %159 = sbr.rel (%p740_p8) target bundleno = 83 (0x53), region = 28 }
  0x1b   : > { %474 = dma.hbm_to_vmem [thread:$0]  (!%p472_p10), %s149_s21, 32, %s151_s16, %s137_s18  }
  0x1f   : > { %631 = dma.done.wait (%p717_p1), [#allocation5], 32  }
  0x20   : > { %633 = vsyncadd (%p717_p1), [#allocation5], 4294967264  ;;  %s782_s22 = sand.u32 1, %s648_s10  }
  0x21   : > { %s446_s23 = sshll.u32 %s782_s22, 1  ;;  %s167_s26 = scalar_lea.sflag [#allocation3], %s782_s22 }
  0x22   : > { %s786_s27 = scalar_lea.vmem [#allocation6], %s446_s23 }
  0x23   : > { %635 = dma.done.wait (%p727_p4), %s167_s26, 32  }
  0x24   : > { %637 = vsyncadd (%p727_p4), %s167_s26, 4294967264 }
  0x25   : > { %176 = sfence }
  0x26   : > { %v195_v0 = vlaneseq  ;;  %s793_s17 = sshll.u32 %s656_s12, 7  ;;  %v667_v13 = vmov 0.0   ;;  %v232_v30 = vld [vmem:[%s786_s27] sm:$0x3]  ;;  %s447_s27 = sshll.u32 %s782_s22, 3  ;;  %vm307_vm4 = vcmask 1040384  }
  0x27   : > { %s238_s24 = sadd.s32 1, %s793_s17  ;;  %s257_s19 = sadd.s32 3, %s793_s17  ;;  %v251_v42 = vperm.slane %v232_v30, 0  ;;  %v252_v43 = vperm.slane %v232_v30, 1  ;;  %vm310_vm5 = vcmask 1041408   ;;  %vm313_vm6 = vcmask 1042432  }
  0x28   : > { %v196_v1 = vand.u32 127, %v195_v0  ;;  %s798_s28 = sld [smem:[#allocation2 + %s793_s17]]  ;;  %s262_s30 = sadd.s32 4, %s793_s17  ;;  %vm319_vm7 = vcmask 1043456  }
  0x29   : > { %s801_s4 = sld [smem:[#allocation2 + %s238_s24]]  ;;  %s281_s5 = sadd.s32 7, %s793_s17 }
  0x2a   : > { %v197_v2 = vadd.s32 128, %v196_v1  ;;  %v202_v3 = vcvt.s32.f32 %v196_v1  ;;  %s804_s6 = sld [smem:[#allocation2 + %s257_s19]]  ;;  %s276_s8 = sadd.s32 6, %s793_s17 }
  0x2b   : > { %s806_s7 = sld [smem:[#allocation2 + %s262_s30]]  ;;  %s245_s16 = sadd.s32 2, %s793_s17 }
  0x2c   : > { %v203_v4 = vcvt.s32.f32 %v197_v2  ;;  %v204_v5 = vmul.f32 0.0625, %v202_v3  ;;  %s809_s15 = sld [smem:[#allocation2 + %s281_s5]]  ;;  %s269_s21 = sadd.s32 5, %s793_s17 }
  0x2d   : > { %s813_s18 = sld [smem:[#allocation2 + %s276_s8]]  ;;  %s288_s23 = sadd.s32 8, %s793_s17 }
  0x2e   : > { %v205_v6 = vmul.f32 0.0625, %v203_v4  ;;  %v206_v7 = vfloor.f32 %v204_v5  ;;  %s816_s26 = sld [smem:[#allocation2 + %s245_s16]]  ;;  %v235_v25 = vstv %s798_s28  ;;  %s458_s17 = sshll.u32 %s656_s12, 3 }
  0x2f   : > { %s818_s24 = sld [smem:[#allocation2 + %s269_s21]]  ;;  %v240_v23 = vstv %s801_s4  ;;  %s337_s4 = scalar_lea.hbm %s873_s2, %s458_s17 }
  0x30   : > { %v207_v8 = vfloor.f32 %v205_v6  ;;  %v208_v9 = vmul.f32 16.0, %v206_v7  ;;  %s820_s19 = sld [smem:[#allocation2 + %s288_s23]]  ;;  %v259_v26 = vstv %s804_s6  ;;  %s192_s5 = scalar_lea.vmem [#allocation7], %s447_s27 }
  0x31   : > { %v264_v24 = vstv %s806_s7  ;;  %s339_s12 = sshll.u32 %s192_s5, 4  ;;  %s341_s6 = sshll.u32 %s337_s4, 4  ;;  %s340_s12 = int_to_ptr.vmem [resolvable:$true] %s339_s12  ;;  %s342_s6 = int_to_ptr.hbm [resolvable:$true] %s341_s6 }
  0x32   : > { %v209_v10 = vmul.f32 16.0, %v207_v8  ;;  %v210_v11 = vsub.f32 %v202_v3, %v208_v9  ;;  %v283_v27 = vstv %s809_s15  ;;  %s324_s7 = scalar_lea.sflag [#allocation4], %s782_s22  ;;  %s592_s8 = sshra.s32 %s342_s6, 4  ;;  %s593_s8 = int_to_ptr.hbm [resolvable:$true] %s592_s8 }
  0x33   : > { %v278_v35 = vstv %s813_s18  ;;  %s594_s15 = scalar_lea.hbm %s593_s8, 8  ;;  %s598_s18 = scalar_lea.hbm %s873_s2, 16 }
  0x34   : > { %v211_v12 = vsub.f32 %v203_v4, %v209_v10  ;;  %vm212_vm0 = vcmp.ge.f32.partialorder %v210_v11, 16.0  ;;  %vm220_vm1 = vcmp.lt.f32.partialorder %v210_v11, 0.0  ;;  %v247_v41 = vstv %s816_s26  ;;  %p595_p1 = scmp.ne.s32.totalorder %s593_s8, %s594_s15  ;;  %p599_p8 = scmp.lt.s32.totalorder %s593_s8, %s873_s2 }
  0x35   : > { %v448_v14 = vsel %vm212_vm0, 1.0, %v667_v13  ;;  %v450_v15 = vsel %vm220_vm1, 1.0, %v667_v13  ;;  %v271_v49 = vstv %s818_s24  ;;  %p600_p11 = scmp.lt.s32.totalorder %s598_s18, %s594_s15 }
  0x36   : > { %vm213_vm2 = vcmp.ge.f32.partialorder %v211_v12, 16.0  ;;  %v218_v16 = vadd.f32 %v448_v14, %v206_v7  ;;  %vm221_vm3 = vcmp.lt.f32.partialorder %v211_v12, 0.0  ;;  %v290_v52 = vstv %s820_s19  ;;  %p596_p2 = pnand %p595_p1, %p761_p9 }
  0x37   : > { %v449_v17 = vsel %vm213_vm2, 1.0, %v667_v13  ;;  %v451_v18 = vsel %vm221_vm3, 1.0, %v667_v13  ;;  %p601_p12 = por %p600_p11, %p599_p8 }
  0x38   : > { %v219_v19 = vadd.f32 %v449_v17, %v207_v8  ;;  %v226_v20 = vsub.f32 %v218_v16, %v450_v15  ;;  %p597_p4 = pneg %p596_p2 }
  0x3a   : > { %v227_v21 = vsub.f32 %v219_v19, %v451_v18  ;;  %v228_v22 = vmul.f32 16.0, %v226_v20  ;;  %v241_v31 = vmul.f32 %v240_v23, %v226_v20  ;;  %v265_v32 = vmul.f32 %v264_v24, %v226_v20  ;;  %p602_p13 = pnand %p601_p12, %p597_p4 }
  0x3b   : > { %v284_v36 = vmul.f32 %v283_v27, %v226_v20 }
  0x3c   : > { %v229_v28 = vmul.f32 16.0, %v227_v21  ;;  %v230_v29 = vsub.f32 %v202_v3, %v228_v22  ;;  %v242_v33 = vmul.f32 %v240_v23, %v227_v21  ;;  %v266_v34 = vmul.f32 %v264_v24, %v227_v21 }
  0x3d   : > { %v285_v44 = vmul.f32 %v283_v27, %v227_v21 }
  0x3e   : > { %v231_v37 = vsub.f32 %v203_v4, %v229_v28  ;;  %v236_v38 = vmul.f32 %v235_v25, %v230_v29  ;;  %v260_v39 = vmul.f32 %v259_v26, %v230_v29  ;;  %v279_v40 = vmul.f32 %v278_v35, %v230_v29 }
  0x40   : > { %v237_v45 = vmul.f32 %v235_v25, %v231_v37  ;;  %v243_v46 = vadd.f32 %v241_v31, %v236_v38  ;;  %v261_v47 = vmul.f32 %v259_v26, %v231_v37  ;;  %v267_v48 = vadd.f32 %v265_v32, %v260_v39 }
  0x41   : > { %v280_v50 = vmul.f32 %v278_v35, %v231_v37  ;;  %v286_v51 = vadd.f32 %v284_v36, %v279_v40 }
  0x42   : > { %v244_v53 = vadd.f32 %v242_v33, %v237_v45  ;;  %v248_v54 = vadd.f32 %v247_v41, %v243_v46  ;;  %v268_v55 = vadd.f32 %v266_v34, %v261_v47  ;;  %v272_v56 = vadd.f32 %v271_v49, %v267_v48 }
  0x43   : > { %v287_v57 = vadd.f32 %v285_v44, %v280_v50  ;;  %v291_v58 = vadd.f32 %v290_v52, %v286_v51 }
  0x44   : > { %v249_v59 = vadd.f32 %v247_v41, %v244_v53  ;;  %v255_v60 = vmul.f32 %v251_v42, %v248_v54  ;;  %v273_v61 = vadd.f32 %v271_v49, %v268_v55  ;;  %v274_v62 = vmul.f32 %v272_v56, %v251_v42 }
  0x45   : > { %v292_v63 = vadd.f32 %v290_v52, %v287_v57  ;;  %v293_v0 = vmul.f32 %v291_v58, %v251_v42 }
  0x46   : > { %v256_v1 = vmul.f32 %v252_v43, %v249_v59  ;;  %v275_v2 = vmul.f32 %v273_v61, %v252_v43  ;;  %v297_v3 = vrot.slane %v274_v62, 7 }
  0x47   : > { %v294_v4 = vmul.f32 %v292_v63, %v252_v43  ;;  %v303_v5 = vrot.slane %v293_v0, 6 }
  0x48   : > { %v298_v6 = vrot.slane %v275_v2, 7  ;;  %v308_v7 = vsel %vm307_vm4, %v255_v60, %v297_v3 }
  0x49   : > { %v304_v8 = vrot.slane %v294_v4, 6  ;;  %v311_v9 = vsel %vm310_vm5, %v308_v7, %v303_v5 }
  0x4a   : > { %v309_v10 = vsel %vm307_vm4, %v256_v1, %v298_v6  ;;  %v314_v12 = vsel %vm313_vm6, %v311_v9, 1.0 }
  0x4b   : > { %v312_v11 = vsel %vm310_vm5, %v309_v10, %v304_v8 }
  0x4c   : > { %v315_v13 = vsel %vm313_vm6, %v312_v11, 1.0 }
  0x4d   : > { %v318_v14 = vrot.slane %v315_v13, 4 }
  0x4f   : > { %v320_v15 = vsel %vm319_vm7, %v314_v12, %v318_v14 }
  0x50   : > { %322 = vst [vmem:[%s192_s5] sm:$0xff] %v320_v15 }
  0x51   : > { %605 = shalt.err (!%p602_p13)
}
  0x52   : > { %465 = dma.vmem_to_hbm [thread:$0]  (%p761_p9), %s340_s12, 128, %s342_s6, %s324_s7  }
  0x53 PF: > { %s353_s22 = sand.u32 1, %s644_s9   ;;  %p880_p0 = scmp.ge.s32.totalorder %s664_s14, 2 }
  0x54   : > { %s354_s24 = scalar_lea.sflag [#allocation4], %s353_s22 }
  0x55   : > { %p476_p3 = pnand %p880_p0, %p732_p6 }
  0x57   : > { %p477_p5 = pneg %p476_p3 }
  0x59   : > { %639 = dma.done.wait (%p477_p5), %s354_s24, 128  }
  0x5a   : > { %641 = vsyncadd (%p477_p5), %s354_s24, 4294967168  ;;  %s19_s14 = sadd.s32 1, %s664_s14   ;;  %s881_s9 = smov %s648_s10 }
  0x5b   : > { %p16_p7 = scmp.ge.s32.totalorder %s19_s14, 4   ;;  %s882_s10 = smov %s652_s11 }
  0x5c   : > { %s883_s11 = smov %s767_s3  ;;  %s884_s12 = smov %s660_s13 }
  0x5d   : > { %s885_s13 = smov %s887_s25  ;;  %18 = sbr.rel (!%p16_p7) target bundleno = 7 (0x7), region = 78 }
  0x62   :  { %360 = vsyncpa [#allocation3], 1 }
  0x63   :  { %362 = vsyncpa [#allocation3 + $0x1], 1 }
  0x64   :  { %363 = vsyncpa [#allocation4], 1 }
  0x65   :  { %365 = vsyncpa [#allocation4 + $0x1], 1 }
  0x66   :  { %366 = vsyncpa [#allocation5], 1 }
  0x67   :  { %368 = vsyncpa [#allocation5 + $0x1], 1 }

</bundles_post_ra>
